<compile_context>
chip_gen: v6e
topology: v6e:2x2x1
jax: 0.10.0
libtpu: 0.0.40
codegen_flags: <defaults>
</compile_context>

<pallas_src>
import jax
import jax.numpy as jnp
from jax.experimental import pallas as pl
from jax.experimental.pallas import tpu as pltpu


_LANE = 128     # lane width (last-dim tiling unit)
_SUBLANE = 8    # f32/bf16-safe sublane rounding for the batch axis


def _round_up(n, m):
    return ((n + m - 1) // m) * m


# --------------------------------------------------------------------------- #
# Kernel
# --------------------------------------------------------------------------- #
def _make_ae_kernel(relu_flags, matmul_dtype):
    """Fused L-layer MLP chain.  Fully unrolled (L is static)."""

    def kernel(x_ref, w_ref, b_ref, out_ref):
        h = x_ref[...]                                  # (tile, D), matmul_dtype
        for l, relu in enumerate(relu_flags):
            y = jnp.dot(h.astype(matmul_dtype), w_ref[l],          # MXU, bf16 ops
                        preferred_element_type=jnp.float32)        # f32 accumulate
            y = y + b_ref[l:l + 1, :]                               # (1, D) f32 bias
            if relu:
                y = jnp.maximum(y, 0.0)
            h = y
        out_ref[...] = h.astype(out_ref.dtype)

    return kernel


# --------------------------------------------------------------------------- #
# One-time parameter preparation (hoisted out of the hot path)
# --------------------------------------------------------------------------- #
def prepare_ae_params(params, matmul_dtype=jnp.bfloat16):
    """Pad, cast and stack the per-layer (W [in, out], b [.., out]) params.

    Returns (w_stacked [L, D, D] in matmul_dtype, b_stacked [L, D] f32, meta).
    Padding is exact: padded weight rows/cols and bias entries are zero, so
    padded activation lanes stay exactly zero through the whole chain.
    """
    L = len(params)
    dims = [params[0][0].shape[0]] + [w.shape[1] for w, _ in params]
    D = _round_up(max(dims), _LANE)

    w_stacked = jnp.zeros((L, D, D), matmul_dtype)
    b_stacked = jnp.zeros((L, D), jnp.float32)
    for l, (w, b) in enumerate(params):
        fin, fout = w.shape
        w_stacked = w_stacked.at[l, :fin, :fout].set(w.astype(matmul_dtype))
        b_stacked = b_stacked.at[l, :fout].set(
            jnp.reshape(b, (-1,)).astype(jnp.float32))

    n_enc = L // 2
    relu = tuple((l != n_enc - 1) and (l != L - 1) for l in range(L))
    meta = dict(feature_dim=D,
                in_features=dims[0],
                out_features=dims[-1],
                relu=relu,
                matmul_dtype=matmul_dtype)
    return w_stacked, b_stacked, meta


# --------------------------------------------------------------------------- #
# Forward wrapper
# --------------------------------------------------------------------------- #
def ae_forward(x, w_stacked, b_stacked, meta, *, batch_tile=1024, out_dtype=None):
    """Fused AE forward.

    x:          [B, in_features].
    batch_tile: rows per grid step (main knob).  Capped at ceil(B/2) so the
                grid keeps >= 2 steps for v7x's two TensorCores.
    out_dtype:  output dtype (default: x.dtype; pass jnp.bfloat16 to halve
                output HBM traffic if the consumer allows).
    """
    B, in_features = x.shape
    D = meta["feature_dim"]
    out_features = meta["out_features"]
    matmul_dtype = meta["matmul_dtype"]
    out_dtype = x.dtype if out_dtype is None else out_dtype

    # Cast activations to the MXU dtype up front (halves input HBM bytes on
    # the bf16 path; numerically identical to casting before the first dot).
    x = x.astype(matmul_dtype)

    # ---- batch tile: big by default, but always >= 2 grid steps if possible.
    tile = max(_SUBLANE, _round_up(min(batch_tile, B), _SUBLANE))
    if B > _SUBLANE:
        half = max(_SUBLANE, _round_up((B + 1) // 2, _SUBLANE))
        tile = min(tile, half)                     # grid >= 2 → both v7x TCs busy
    B_pad = _round_up(B, tile)

    # ---- exact zero-padding of batch rows and feature lanes.
    if B_pad != B or D != in_features:
        x = jnp.pad(x, ((0, B_pad - B), (0, D - in_features)))
    grid = (B_pad // tile,)

    # ---- VMEM budget: raise scoped limit only if actually needed.
    elt_in = jnp.dtype(matmul_dtype).itemsize
    elt_out = jnp.dtype(out_dtype).itemsize
    io_bytes = 2 * tile * D * (elt_in + elt_out)              # dbl-buffered in+out
    par_bytes = 2 * (w_stacked.size * w_stacked.dtype.itemsize
                     + b_stacked.size * b_stacked.dtype.itemsize)
    act_bytes = 4 * tile * D * 4                               # live f32 activations
    vmem_est = io_bytes + par_bytes + act_bytes
    cp_kwargs = dict(dimension_semantics=("parallel",))
    if vmem_est > 16 * 1024 * 1024:                            # v5e default scoped limit
        cp_kwargs["vmem_limit_bytes"] = int(min(2 * vmem_est, 48 * 1024 * 1024))

    out = pl.pallas_call(
        _make_ae_kernel(meta["relu"], matmul_dtype),
        out_shape=jax.ShapeDtypeStruct((B_pad, D), out_dtype),
        grid=grid,
        in_specs=[
            pl.BlockSpec((tile, D), lambda i: (i, 0)),                 # activations
            pl.BlockSpec(w_stacked.shape, lambda i: (0, 0, 0)),        # weights (resident)
            pl.BlockSpec(b_stacked.shape, lambda i: (0, 0)),           # biases (resident)
        ],
        out_specs=pl.BlockSpec((tile, D), lambda i: (i, 0)),
        compiler_params=pltpu.CompilerParams(**cp_kwargs),
    )(x, w_stacked, b_stacked)

    return out[:B, :out_features]


# --------------------------------------------------------------------------- #
# Init + reference
# --------------------------------------------------------------------------- #
def init_ae_params(key, input_dim, hidden_dim):
    """Deterministic init mimicking nn.Linear default U(-1/sqrt(fan_in), +).
    Weights are produced directly as [in, out] (transposed vs. torch)."""
    sizes = [
        (input_dim, hidden_dim[0]),
        (hidden_dim[0], hidden_dim[1]),
        (hidden_dim[1], hidden_dim[2]),
        (hidden_dim[2], hidden_dim[3]),
        (hidden_dim[3], hidden_dim[2]),
        (hidden_dim[2], hidden_dim[1]),
        (hidden_dim[1], hidden_dim[0]),
        (hidden_dim[0], input_dim),
    ]
    params = []
    for (fan_in, fan_out) in sizes:
        key, kw, kb = jax.random.split(key, 3)
        bound = 1.0 / (fan_in ** 0.5)
        w = jax.random.uniform(kw, (fan_in, fan_out), jnp.float32,
                               minval=-bound, maxval=bound)
        b = jax.random.uniform(kb, (1, fan_out), jnp.float32,
                               minval=-bound, maxval=bound)
        params.append((w, b))
    return params


def ae_reference(x, params):
    """Plain-JAX f32 reference for correctness checking."""
    h = x
    for idx, (w, b) in enumerate(params):
        h = h @ w + b
        if idx not in (3, 7):        # no ReLU after bottleneck / output layers
            h = jnp.maximum(h, 0.0)
    return h


# --------------------------------------------------------------------------- #
# Demo / self-test
# --------------------------------------------------------------------------- #
if __name__ == "__main__":
    key = jax.random.PRNGKey(0)

    input_dim = 128
    hidden_dim = [64, 32, 16, 8]
    params = init_ae_params(key, input_dim, hidden_dim)

    # One-time parameter prep (hoisted out of the hot path).
    w_bf16, b_bf16, meta_bf16 = prepare_ae_params(params)                    # bf16 default
    w_f32, b_f32, meta_f32 = prepare_ae_params(params, matmul_dtype=jnp.float32)

    # ---- small batch, f32 MXU path (precision check, tight tolerance) ------
    key, kx = jax.random.split(key)
    x_small = jax.random.normal(kx, (8, input_dim), jnp.float32)
    out_f32 = jax.block_until_ready(ae_forward(x_small, w_f32, b_f32, meta_f32))
    ref_small = ae_reference(x_small, params)
    assert out_f32.shape == x_small.shape
    assert jnp.allclose(out_f32, ref_small, atol=1e-4, rtol=1e-4), \
        "f32 mismatch vs reference"

    # ---- ragged batch, multi-step grid, default bf16 MXU + bf16 input ------
    # NOTE: activations are re-cast to bf16 at every layer, so error compounds
    # across 8 layers; 5e-2 tolerance covers it.
    key, kx = jax.random.split(key)
    x_big = jax.random.normal(kx, (300, input_dim), jnp.float32)
    out_bf16 = jax.block_until_ready(ae_forward(x_big, w_bf16, b_bf16, meta_bf16))
    ref_big = ae_reference(x_big, params)
    assert out_bf16.shape == x_big.shape
    assert out_bf16.dtype == x_big.dtype
    assert jnp.allclose(out_bf16, ref_big, atol=5e-2, rtol=5e-2), \
        "bf16 mismatch vs reference"

    # ---- optional bf16 output path (halves output HBM traffic) -------------
    out_bf16_io = jax.block_until_ready(
        ae_forward(x_big, w_bf16, b_bf16, meta_bf16, out_dtype=jnp.bfloat16))
    assert out_bf16_io.dtype == jnp.bfloat16
    assert jnp.allclose(out_bf16_io.astype(jnp.float32), ref_big,
                        atol=7e-2, rtol=7e-2), "bf16-io mismatch vs reference"

    print("KERNEL_OK")
</pallas_src>

<mosaic_0001>
module attributes {stable_mosaic.version = 11 : i64} {
  func.func @kernel(%arg0: i32, %arg1: memref<8x128xf32, #tpu.memory_space<vmem>>, %arg2: memref<8x128x128xf32, #tpu.memory_space<vmem>>, %arg3: memref<8x128xf32, #tpu.memory_space<vmem>>, %arg4: memref<8x128xf32, #tpu.memory_space<vmem>>) attributes {dimension_semantics = [#tpu.dimension_semantics<parallel>], iteration_bounds = array<i64: 1>, scalar_prefetch = 0 : i64, scratch_operands = 0 : i64, tpu.core_type = #tpu.core_type<tc>, window_params = [{transform_indices = @transform_0, window_bounds = array<i64: 8, 128>}, {pipeline_mode = #tpu.pipeline_mode<synchronous>, transform_indices = @transform_1, window_bounds = array<i64: 8, 128, 128>}, {pipeline_mode = #tpu.pipeline_mode<synchronous>, transform_indices = @transform_2, window_bounds = array<i64: 8, 128>}, {transform_indices = @transform_3, window_bounds = array<i64: 8, 128>}]} {
    %c0 = arith.constant 0 : index
    %c0_0 = arith.constant 0 : index
    %0 = vector.load %arg1[%c0, %c0_0] : memref<8x128xf32, #tpu.memory_space<vmem>>, vector<8x128xf32>
    %c0_1 = arith.constant 0 : index
    %c0_2 = arith.constant 0 : index
    %c0_3 = arith.constant 0 : index
    %1 = vector.load %arg2[%c0_1, %c0_2, %c0_3] : memref<8x128x128xf32, #tpu.memory_space<vmem>>, vector<1x128x128xf32>
    %2 = vector.shape_cast %1 : vector<1x128x128xf32> to vector<128x128xf32>
    %cst = arith.constant dense<0.000000e+00> : vector<8x128xf32>
    %3 = tpu.matmul %0, %2, %cst {dimension_numbers = #tpu.dot_dimension_numbers<[1], [0], [0], [1], [0, 0, 1, 1], [], []>} : vector<8x128xf32>, vector<128x128xf32>, vector<8x128xf32> -> vector<8x128xf32>
    %c0_4 = arith.constant 0 : index
    %c0_5 = arith.constant 0 : index
    %4 = vector.load %arg3[%c0_4, %c0_5] : memref<8x128xf32, #tpu.memory_space<vmem>>, vector<1x128xf32>
    %5 = vector.broadcast %4 : vector<1x128xf32> to vector<8x128xf32>
    %6 = arith.addf %3, %5 : vector<8x128xf32>
    %cst_6 = arith.constant 0.000000e+00 : f32
    %7 = vector.broadcast %cst_6 : f32 to vector<8x128xf32>
    %8 = arith.maximumf %6, %7 : vector<8x128xf32>
    %c1 = arith.constant 1 : index
    %c0_7 = arith.constant 0 : index
    %c0_8 = arith.constant 0 : index
    %9 = vector.load %arg2[%c1, %c0_7, %c0_8] : memref<8x128x128xf32, #tpu.memory_space<vmem>>, vector<1x128x128xf32>
    %10 = vector.shape_cast %9 : vector<1x128x128xf32> to vector<128x128xf32>
    %cst_9 = arith.constant dense<0.000000e+00> : vector<8x128xf32>
    %11 = tpu.matmul %8, %10, %cst_9 {dimension_numbers = #tpu.dot_dimension_numbers<[1], [0], [0], [1], [0, 0, 1, 1], [], []>} : vector<8x128xf32>, vector<128x128xf32>, vector<8x128xf32> -> vector<8x128xf32>
    %c1_10 = arith.constant 1 : index
    %c0_11 = arith.constant 0 : index
    %12 = vector.load %arg3[%c1_10, %c0_11] : memref<8x128xf32, #tpu.memory_space<vmem>>, vector<1x128xf32>
    %13 = vector.broadcast %12 : vector<1x128xf32> to vector<8x128xf32>
    %14 = arith.addf %11, %13 : vector<8x128xf32>
    %cst_12 = arith.constant 0.000000e+00 : f32
    %15 = vector.broadcast %cst_12 : f32 to vector<8x128xf32>
    %16 = arith.maximumf %14, %15 : vector<8x128xf32>
    %c2 = arith.constant 2 : index
    %c0_13 = arith.constant 0 : index
    %c0_14 = arith.constant 0 : index
    %17 = vector.load %arg2[%c2, %c0_13, %c0_14] : memref<8x128x128xf32, #tpu.memory_space<vmem>>, vector<1x128x128xf32>
    %18 = vector.shape_cast %17 : vector<1x128x128xf32> to vector<128x128xf32>
    %cst_15 = arith.constant dense<0.000000e+00> : vector<8x128xf32>
    %19 = tpu.matmul %16, %18, %cst_15 {dimension_numbers = #tpu.dot_dimension_numbers<[1], [0], [0], [1], [0, 0, 1, 1], [], []>} : vector<8x128xf32>, vector<128x128xf32>, vector<8x128xf32> -> vector<8x128xf32>
    %c2_16 = arith.constant 2 : index
    %c0_17 = arith.constant 0 : index
    %20 = vector.load %arg3[%c2_16, %c0_17] : memref<8x128xf32, #tpu.memory_space<vmem>>, vector<1x128xf32>
    %21 = vector.broadcast %20 : vector<1x128xf32> to vector<8x128xf32>
    %22 = arith.addf %19, %21 : vector<8x128xf32>
    %cst_18 = arith.constant 0.000000e+00 : f32
    %23 = vector.broadcast %cst_18 : f32 to vector<8x128xf32>
    %24 = arith.maximumf %22, %23 : vector<8x128xf32>
    %c3 = arith.constant 3 : index
    %c0_19 = arith.constant 0 : index
    %c0_20 = arith.constant 0 : index
    %25 = vector.load %arg2[%c3, %c0_19, %c0_20] : memref<8x128x128xf32, #tpu.memory_space<vmem>>, vector<1x128x128xf32>
    %26 = vector.shape_cast %25 : vector<1x128x128xf32> to vector<128x128xf32>
    %cst_21 = arith.constant dense<0.000000e+00> : vector<8x128xf32>
    %27 = tpu.matmul %24, %26, %cst_21 {dimension_numbers = #tpu.dot_dimension_numbers<[1], [0], [0], [1], [0, 0, 1, 1], [], []>} : vector<8x128xf32>, vector<128x128xf32>, vector<8x128xf32> -> vector<8x128xf32>
    %c3_22 = arith.constant 3 : index
    %c0_23 = arith.constant 0 : index
    %28 = vector.load %arg3[%c3_22, %c0_23] : memref<8x128xf32, #tpu.memory_space<vmem>>, vector<1x128xf32>
    %29 = vector.broadcast %28 : vector<1x128xf32> to vector<8x128xf32>
    %30 = arith.addf %27, %29 : vector<8x128xf32>
    %c4 = arith.constant 4 : index
    %c0_24 = arith.constant 0 : index
    %c0_25 = arith.constant 0 : index
    %31 = vector.load %arg2[%c4, %c0_24, %c0_25] : memref<8x128x128xf32, #tpu.memory_space<vmem>>, vector<1x128x128xf32>
    %32 = vector.shape_cast %31 : vector<1x128x128xf32> to vector<128x128xf32>
    %cst_26 = arith.constant dense<0.000000e+00> : vector<8x128xf32>
    %33 = tpu.matmul %30, %32, %cst_26 {dimension_numbers = #tpu.dot_dimension_numbers<[1], [0], [0], [1], [0, 0, 1, 1], [], []>} : vector<8x128xf32>, vector<128x128xf32>, vector<8x128xf32> -> vector<8x128xf32>
    %c4_27 = arith.constant 4 : index
    %c0_28 = arith.constant 0 : index
    %34 = vector.load %arg3[%c4_27, %c0_28] : memref<8x128xf32, #tpu.memory_space<vmem>>, vector<1x128xf32>
    %35 = vector.broadcast %34 : vector<1x128xf32> to vector<8x128xf32>
    %36 = arith.addf %33, %35 : vector<8x128xf32>
    %cst_29 = arith.constant 0.000000e+00 : f32
    %37 = vector.broadcast %cst_29 : f32 to vector<8x128xf32>
    %38 = arith.maximumf %36, %37 : vector<8x128xf32>
    %c5 = arith.constant 5 : index
    %c0_30 = arith.constant 0 : index
    %c0_31 = arith.constant 0 : index
    %39 = vector.load %arg2[%c5, %c0_30, %c0_31] : memref<8x128x128xf32, #tpu.memory_space<vmem>>, vector<1x128x128xf32>
    %40 = vector.shape_cast %39 : vector<1x128x128xf32> to vector<128x128xf32>
    %cst_32 = arith.constant dense<0.000000e+00> : vector<8x128xf32>
    %41 = tpu.matmul %38, %40, %cst_32 {dimension_numbers = #tpu.dot_dimension_numbers<[1], [0], [0], [1], [0, 0, 1, 1], [], []>} : vector<8x128xf32>, vector<128x128xf32>, vector<8x128xf32> -> vector<8x128xf32>
    %c5_33 = arith.constant 5 : index
    %c0_34 = arith.constant 0 : index
    %42 = vector.load %arg3[%c5_33, %c0_34] : memref<8x128xf32, #tpu.memory_space<vmem>>, vector<1x128xf32>
    %43 = vector.broadcast %42 : vector<1x128xf32> to vector<8x128xf32>
    %44 = arith.addf %41, %43 : vector<8x128xf32>
    %cst_35 = arith.constant 0.000000e+00 : f32
    %45 = vector.broadcast %cst_35 : f32 to vector<8x128xf32>
    %46 = arith.maximumf %44, %45 : vector<8x128xf32>
    %c6 = arith.constant 6 : index
    %c0_36 = arith.constant 0 : index
    %c0_37 = arith.constant 0 : index
    %47 = vector.load %arg2[%c6, %c0_36, %c0_37] : memref<8x128x128xf32, #tpu.memory_space<vmem>>, vector<1x128x128xf32>
    %48 = vector.shape_cast %47 : vector<1x128x128xf32> to vector<128x128xf32>
    %cst_38 = arith.constant dense<0.000000e+00> : vector<8x128xf32>
    %49 = tpu.matmul %46, %48, %cst_38 {dimension_numbers = #tpu.dot_dimension_numbers<[1], [0], [0], [1], [0, 0, 1, 1], [], []>} : vector<8x128xf32>, vector<128x128xf32>, vector<8x128xf32> -> vector<8x128xf32>
    %c6_39 = arith.constant 6 : index
    %c0_40 = arith.constant 0 : index
    %50 = vector.load %arg3[%c6_39, %c0_40] : memref<8x128xf32, #tpu.memory_space<vmem>>, vector<1x128xf32>
    %51 = vector.broadcast %50 : vector<1x128xf32> to vector<8x128xf32>
    %52 = arith.addf %49, %51 : vector<8x128xf32>
    %cst_41 = arith.constant 0.000000e+00 : f32
    %53 = vector.broadcast %cst_41 : f32 to vector<8x128xf32>
    %54 = arith.maximumf %52, %53 : vector<8x128xf32>
    %c7 = arith.constant 7 : index
    %c0_42 = arith.constant 0 : index
    %c0_43 = arith.constant 0 : index
    %55 = vector.load %arg2[%c7, %c0_42, %c0_43] : memref<8x128x128xf32, #tpu.memory_space<vmem>>, vector<1x128x128xf32>
    %56 = vector.shape_cast %55 : vector<1x128x128xf32> to vector<128x128xf32>
    %cst_44 = arith.constant dense<0.000000e+00> : vector<8x128xf32>
    %57 = tpu.matmul %54, %56, %cst_44 {dimension_numbers = #tpu.dot_dimension_numbers<[1], [0], [0], [1], [0, 0, 1, 1], [], []>} : vector<8x128xf32>, vector<128x128xf32>, vector<8x128xf32> -> vector<8x128xf32>
    %c7_45 = arith.constant 7 : index
    %c0_46 = arith.constant 0 : index
    %58 = vector.load %arg3[%c7_45, %c0_46] : memref<8x128xf32, #tpu.memory_space<vmem>>, vector<1x128xf32>
    %59 = vector.broadcast %58 : vector<1x128xf32> to vector<8x128xf32>
    %60 = arith.addf %57, %59 : vector<8x128xf32>
    %c0_47 = arith.constant 0 : index
    %c0_48 = arith.constant 0 : index
    %61 = vector.load %arg4[%c0_47, %c0_48] : memref<8x128xf32, #tpu.memory_space<vmem>>, vector<8x128xf32>
    tpu.vector_store %arg4[%c0_47, %c0_48], %60 {strides = array<i32>} : memref<8x128xf32, #tpu.memory_space<vmem>>, vector<8x128xf32>,
    return
  }
  func.func @transform_0(%arg0: i32) -> (i32, i32) {
    %c0_i32 = arith.constant 0 : i32
    %c0_i32_0 = arith.constant 0 : i32
    return %arg0, %c0_i32 : i32, i32
  }
  func.func @transform_1(%arg0: i32) -> (i32, i32, i32) {
    %c0_i32 = arith.constant 0 : i32
    %c0_i32_0 = arith.constant 0 : i32
    %c0_i32_1 = arith.constant 0 : i32
    %c0_i32_2 = arith.constant 0 : i32
    return %c0_i32, %c0_i32_0, %c0_i32_1 : i32, i32, i32
  }
  func.func @transform_2(%arg0: i32) -> (i32, i32) {
    %c0_i32 = arith.constant 0 : i32
    %c0_i32_0 = arith.constant 0 : i32
    %c0_i32_1 = arith.constant 0 : i32
    return %c0_i32, %c0_i32_0 : i32, i32
  }
  func.func @transform_3(%arg0: i32) -> (i32, i32) {
    %c0_i32 = arith.constant 0 : i32
    %c0_i32_0 = arith.constant 0 : i32
    return %arg0, %c0_i32 : i32, i32
  }
}

</mosaic_0001>

<bundles_post_ra>
// kernel: tpu_custom_call.1
= control target key start
LH: loop header
LB: loop body
LE: loop exit
PB: predicated region body
PF: predicated region fallthrough
CT: control target
= control target key end

     0   :  { %8 = vsyncpa [#allocation3], 0  ;;  %s1513_s0 = inlined_call_operand.hbm [shape: f32[8,128], index: 0, kind: input, shape index: {}]   ;;  %s1514_s1 = inlined_call_operand.hbm [shape: f32[8,128,128], index: 1, kind: input, shape index: {}]   ;;  %s1515_s2 = inlined_call_operand.hbm [shape: f32[8,128], index: 2, kind: input, shape index: {}]   ;;  %s1516_s3 = inlined_call_operand.hbm [shape: f32[8,128], index: 3, kind: output, shape index: {}]  }
   0x1   :  { %9 = vsyncpa [#allocation6], 0 }
   0x2   :  { %10 = vsyncpa [#allocation4], 0  ;;  %s1329_s12 = smov [#allocation5]  }
   0x3   :  { %s26_s13 = sshll.u32 %s1329_s12, 4  ;;  %s27_s13 = int_to_ptr.vmem [resolvable:$true] %s26_s13 }
   0x4   :  { %s1251_s14 = scalar_lea.vmem %s27_s13, 16384  ;;  %p1256_p1 = scmp.lt.s32.totalorder %s27_s13, %s27_s13 }
   0x5   :  { %p1252_p0 = scmp.ne.s32.totalorder %s27_s13, %s1251_s14  ;;  %p1257_p2 = scmp.lt.s32.totalorder %s1251_s14, %s1251_s14 }
   0x7   :  { %p1258_p3 = por %p1257_p2, %p1256_p1 }
   0x9   :  { %p1259_p4 = pnand %p1258_p3, %p1252_p0 }
   0xb   :  { %1262 = shalt.err (!%p1259_p4)
}
   0xc   :  { %s1330_s15 = smov 128   ;;  %s1331_s16 = smov 8  }
   0xd   :  { %32 = dma.hbm_to_vmem [thread:$0]  %s1514_s1, 16384, %s27_s13, [#allocation6], %s1330_s15, %s1330_s15, %s1331_s16  }
   0xe   :  { %s1332_s19 = smov [#allocation2]   ;;  %s1333_s21 = smov [#allocation7]  }
   0xf   :  { %s17_s20 = sshll.u32 %s1332_s19, 4  ;;  %s39_s22 = sshll.u32 %s1333_s21, 4  ;;  %s18_s20 = int_to_ptr.vmem [resolvable:$true] %s17_s20  ;;  %s40_s22 = int_to_ptr.vmem [resolvable:$true] %s39_s22 }
  0x10   :  { %s1271_s23 = scalar_lea.vmem %s18_s20, 128  ;;  %p1276_p6 = scmp.lt.s32.totalorder %s18_s20, %s18_s20 }
  0x11   :  { %p1272_p5 = scmp.ne.s32.totalorder %s18_s20, %s1271_s23  ;;  %p1277_p7 = scmp.lt.s32.totalorder %s1271_s23, %s1271_s23 }
  0x13   :  { %p1278_p8 = por %p1277_p7, %p1276_p6 }
  0x15   :  { %p1279_p9 = pnand %p1278_p8, %p1272_p5 }
  0x17   :  { %1282 = shalt.err (!%p1279_p9)
}
  0x18   :  { %20 = dma.hbm_to_vmem [thread:$0]  %s1513_s0, 128, %s18_s20, [#allocation3]  }
  0x19   :  { %s1291_s26 = scalar_lea.vmem %s40_s22, 128  ;;  %p1296_p11 = scmp.lt.s32.totalorder %s40_s22, %s40_s22 }
  0x1a   :  { %p1292_p10 = scmp.ne.s32.totalorder %s40_s22, %s1291_s26  ;;  %p1297_p12 = scmp.lt.s32.totalorder %s1291_s26, %s1291_s26 }
  0x1c   :  { %p1298_p13 = por %p1297_p12, %p1296_p11 }
  0x1e   :  { %p1299_p0 = pnand %p1298_p13, %p1292_p10 }
  0x20   :  { %1302 = shalt.err (!%p1299_p0)
}
  0x21   :  { %42 = dma.hbm_to_vmem [thread:$0]  %s1515_s2, 128, %s40_s22, [#allocation6]  }
  0x22   :  { %1323 = dma.done.wait [#allocation3], 128  }
  0x23   :  { %1324 = vsyncadd [#allocation3], 4294967168 }
  0x24   :  { %1325 = dma.done.wait [#allocation6], 16512  }
  0x25   :  { %1326 = vsyncadd [#allocation6], 4294950784  ;;  %v1334_v0 = vmov 0.0   ;;  %vm1335_vm0 = vmmov 0   ;;  %v68_v1 = vld [vmem:[#allocation5 + $0x78] sm:$0xff]  ;;  %v67_v2 = vld [vmem:[#allocation5 + $0x70] sm:$0xff] }
  0x26   :  { %955 = vmatprep.subr.mxu0 %v1334_v0  ;;  %987 = vmatprep.mubr.msk.f32.mxu0 %vm1335_vm0, %v1334_v0  ;;  %v66_v3 = vld [vmem:[#allocation5 + $0x68] sm:$0xff]  ;;  %v65_v4 = vld [vmem:[#allocation5 + $0x60] sm:$0xff]  ;;  %v161_v5 = vld [vmem:[#allocation5 + $0xf8] sm:$0xff]  ;;  %s1336_s0 = smov [#allocation8]  }
  0x27   :  { %990 = vmatprep.subr.mxu1 %v1334_v0  ;;  %1022 = vmatprep.mubr.msk.f32.mxu1 %vm1335_vm0, %v1334_v0  ;;  %v64_v6 = vld [vmem:[#allocation5 + $0x58] sm:$0xff]  ;;  %v160_v7 = vld [vmem:[#allocation5 + $0xf0] sm:$0xff]  ;;  %v159_v8 = vld [vmem:[#allocation5 + $0xe8] sm:$0xff]  ;;  %s801_s2 = sshll.u32 %s1336_s0, 4  ;;  %s802_s2 = int_to_ptr.vmem [resolvable:$true] %s801_s2 }
  0x28   :  { %956 = vmatpush3.msra.mxu0 %v68_v1  ;;  %991 = vmatpush3.msra.mxu1 %v161_v5  ;;  %v63_v9 = vld [vmem:[#allocation5 + $0x50] sm:$0xff]  ;;  %v158_v10 = vld [vmem:[#allocation5 + $0xe0] sm:$0xff]  ;;  %v62_v11 = vld [vmem:[#allocation5 + $0x48] sm:$0xff]  ;;  %s1303_s28 = scalar_lea.vmem %s802_s2, 128  ;;  %p1308_p2 = scmp.lt.s32.totalorder %s802_s2, %s802_s2 }
  0x29   :  { %957 = vmatprep.subr.mxu0 %v1334_v0  ;;  %992 = vmatprep.subr.mxu1 %v1334_v0  ;;  %v157_v12 = vld [vmem:[#allocation5 + $0xd8] sm:$0xff]  ;;  %v61_v13 = vld [vmem:[#allocation5 + $0x40] sm:$0xff]  ;;  %v156_v14 = vld [vmem:[#allocation5 + $0xd0] sm:$0xff]  ;;  %p1304_p1 = scmp.ne.s32.totalorder %s802_s2, %s1303_s28  ;;  %p1309_p3 = scmp.lt.s32.totalorder %s1303_s28, %s1303_s28 }
  0x2a   :  { %958 = vmatpush3.msra.mxu0 %v67_v2  ;;  %993 = vmatpush3.msra.mxu1 %v160_v7  ;;  %v60_v15 = vld [vmem:[#allocation5 + $0x38] sm:$0xff]  ;;  %v155_v16 = vld [vmem:[#allocation5 + $0xc8] sm:$0xff]  ;;  %v59_v17 = vld [vmem:[#allocation5 + $0x30] sm:$0xff] }
  0x2b   :  { %959 = vmatprep.subr.mxu0 %v1334_v0  ;;  %994 = vmatprep.subr.mxu1 %v1334_v0  ;;  %v154_v18 = vld [vmem:[#allocation5 + $0xc0] sm:$0xff]  ;;  %v58_v19 = vld [vmem:[#allocation5 + $0x28] sm:$0xff]  ;;  %v153_v20 = vld [vmem:[#allocation5 + $0xb8] sm:$0xff]  ;;  %p1310_p4 = por %p1309_p3, %p1308_p2 }
  0x2c   :  { %960 = vmatpush3.msra.mxu0 %v66_v3  ;;  %995 = vmatpush3.msra.mxu1 %v159_v8  ;;  %v57_v21 = vld [vmem:[#allocation5 + $0x20] sm:$0xff]  ;;  %v152_v22 = vld [vmem:[#allocation5 + $0xb0] sm:$0xff]  ;;  %v56_v23 = vld [vmem:[#allocation5 + $0x18] sm:$0xff] }
  0x2d   :  { %961 = vmatprep.subr.mxu0 %v1334_v0  ;;  %996 = vmatprep.subr.mxu1 %v1334_v0  ;;  %v151_v24 = vld [vmem:[#allocation5 + $0xa8] sm:$0xff]  ;;  %v55_v25 = vld [vmem:[#allocation5 + $0x10] sm:$0xff]  ;;  %v150_v26 = vld [vmem:[#allocation5 + $0xa0] sm:$0xff]  ;;  %p1311_p5 = pnand %p1310_p4, %p1304_p1 }
  0x2e   :  { %962 = vmatpush3.msra.mxu0 %v65_v4  ;;  %997 = vmatpush3.msra.mxu1 %v158_v10  ;;  %v54_v27 = vld [vmem:[#allocation5 + $0x8] sm:$0xff]  ;;  %v149_v28 = vld [vmem:[#allocation5 + $0x98] sm:$0xff]  ;;  %v53_v29 = vld [vmem:[#allocation5] sm:$0xff] }
  0x2f   :  { %963 = vmatprep.subr.mxu0 %v1334_v0  ;;  %998 = vmatprep.subr.mxu1 %v1334_v0  ;;  %v52_v30 = vld [vmem:[#allocation2] sm:$0xff]  ;;  %v148_v31 = vld [vmem:[#allocation5 + $0x90] sm:$0xff]  ;;  %v147_v32 = vld [vmem:[#allocation5 + $0x88] sm:$0xff] }
  0x30   :  { %964 = vmatpush3.msra.mxu0 %v64_v6  ;;  %999 = vmatpush3.msra.mxu1 %v157_v12  ;;  %v146_v33 = vld [vmem:[#allocation5 + $0x80] sm:$0xff]  ;;  %v254_v34 = vld [vmem:[#allocation5 + $0x178] sm:$0xff]  ;;  %v253_v35 = vld [vmem:[#allocation5 + $0x170] sm:$0xff] }
  0x31   :  { %965 = vmatprep.subr.mxu0 %v1334_v0  ;;  %1000 = vmatprep.subr.mxu1 %v1334_v0  ;;  %v252_v36 = vld [vmem:[#allocation5 + $0x168] sm:$0xff]  ;;  %v251_v37 = vld [vmem:[#allocation5 + $0x160] sm:$0xff]  ;;  %v250_v38 = vld [vmem:[#allocation5 + $0x158] sm:$0xff] }
  0x32   :  { %966 = vmatpush3.msra.mxu0 %v63_v9  ;;  %1001 = vmatpush3.msra.mxu1 %v156_v14  ;;  %v249_v39 = vld [vmem:[#allocation5 + $0x150] sm:$0xff]  ;;  %v248_v40 = vld [vmem:[#allocation5 + $0x148] sm:$0xff]  ;;  %v247_v41 = vld [vmem:[#allocation5 + $0x140] sm:$0xff] }
  0x33   :  { %967 = vmatprep.subr.mxu0 %v1334_v0  ;;  %1002 = vmatprep.subr.mxu1 %v1334_v0  ;;  %v246_v42 = vld [vmem:[#allocation5 + $0x138] sm:$0xff]  ;;  %v245_v43 = vld [vmem:[#allocation5 + $0x130] sm:$0xff]  ;;  %v244_v44 = vld [vmem:[#allocation5 + $0x128] sm:$0xff] }
  0x34   :  { %968 = vmatpush3.msra.mxu0 %v62_v11  ;;  %1003 = vmatpush3.msra.mxu1 %v155_v16  ;;  %v243_v45 = vld [vmem:[#allocation5 + $0x120] sm:$0xff]  ;;  %v242_v46 = vld [vmem:[#allocation5 + $0x118] sm:$0xff]  ;;  %v241_v52 = vld [vmem:[#allocation5 + $0x110] sm:$0xff] }
  0x35   :  { %969 = vmatprep.subr.mxu0 %v1334_v0  ;;  %1004 = vmatprep.subr.mxu1 %v1334_v0  ;;  %v811_v47 = vld [vmem:[#allocation7] ss:$0 sm:$0xff]  ;;  %v240_v53 = vld [vmem:[#allocation5 + $0x108] sm:$0xff]  ;;  %v347_v55 = vld [vmem:[#allocation5 + $0x1f8] sm:$0xff] }
  0x36   :  { %970 = vmatpush3.msra.mxu0 %v61_v13  ;;  %1005 = vmatpush3.msra.mxu1 %v154_v18  ;;  %v239_v54 = vld [vmem:[#allocation5 + $0x100] sm:$0xff]  ;;  %v346_v56 = vld [vmem:[#allocation5 + $0x1f0] sm:$0xff]  ;;  %v345_v57 = vld [vmem:[#allocation5 + $0x1e8] sm:$0xff] }
  0x37   :  { %971 = vmatprep.subr.mxu0 %v1334_v0  ;;  %1006 = vmatprep.subr.mxu1 %v1334_v0  ;;  %v344_v58 = vld [vmem:[#allocation5 + $0x1e0] sm:$0xff]  ;;  %v343_v59 = vld [vmem:[#allocation5 + $0x1d8] sm:$0xff]  ;;  %v342_v60 = vld [vmem:[#allocation5 + $0x1d0] sm:$0xff] }
  0x38   :  { %972 = vmatpush3.msra.mxu0 %v60_v15  ;;  %1007 = vmatpush3.msra.mxu1 %v153_v20  ;;  %v341_v61 = vld [vmem:[#allocation5 + $0x1c8] sm:$0xff]  ;;  %v340_v62 = vld [vmem:[#allocation5 + $0x1c0] sm:$0xff]  ;;  %v339_v63 = vld [vmem:[#allocation5 + $0x1b8] sm:$0xff] }
  0x39   :  { %973 = vmatprep.subr.mxu0 %v1334_v0  ;;  %1008 = vmatprep.subr.mxu1 %v1334_v0  ;;  %v338_v1 = vld [vmem:[#allocation5 + $0x1b0] sm:$0xff]  ;;  %v337_v2 = vld [vmem:[#allocation5 + $0x1a8] sm:$0xff]  ;;  %v336_v3 = vld [vmem:[#allocation5 + $0x1a0] sm:$0xff] }
  0x3a   :  { %974 = vmatpush3.msra.mxu0 %v59_v17  ;;  %1009 = vmatpush3.msra.mxu1 %v152_v22  ;;  %v335_v4 = vld [vmem:[#allocation5 + $0x198] sm:$0xff]  ;;  %v812_v5 = vld [vmem:[#allocation7 + $0x1] ss:$0 sm:$0xff]  ;;  %v334_v10 = vld [vmem:[#allocation5 + $0x190] sm:$0xff] }
  0x3b   :  { %975 = vmatprep.subr.mxu0 %v1334_v0  ;;  %1010 = vmatprep.subr.mxu1 %v1334_v0  ;;  %v333_v11 = vld [vmem:[#allocation5 + $0x188] sm:$0xff]  ;;  %v332_v12 = vld [vmem:[#allocation5 + $0x180] sm:$0xff]  ;;  %v439_v13 = vld [vmem:[#allocation5 + $0x278] sm:$0xff] }
  0x3c   :  { %976 = vmatpush3.msra.mxu0 %v58_v19  ;;  %1011 = vmatpush3.msra.mxu1 %v151_v24  ;;  %v438_v14 = vld [vmem:[#allocation5 + $0x270] sm:$0xff]  ;;  %v437_v15 = vld [vmem:[#allocation5 + $0x268] sm:$0xff]  ;;  %v436_v16 = vld [vmem:[#allocation5 + $0x260] sm:$0xff] }
  0x3d   :  { %977 = vmatprep.subr.mxu0 %v1334_v0  ;;  %1012 = vmatprep.subr.mxu1 %v1334_v0  ;;  %v435_v17 = vld [vmem:[#allocation5 + $0x258] sm:$0xff]  ;;  %v434_v18 = vld [vmem:[#allocation5 + $0x250] sm:$0xff]  ;;  %v433_v19 = vld [vmem:[#allocation5 + $0x248] sm:$0xff] }
  0x3e   :  { %978 = vmatpush3.msra.mxu0 %v57_v21  ;;  %1013 = vmatpush3.msra.mxu1 %v150_v26  ;;  %v432_v20 = vld [vmem:[#allocation5 + $0x240] sm:$0xff]  ;;  %v431_v21 = vld [vmem:[#allocation5 + $0x238] sm:$0xff]  ;;  %v430_v22 = vld [vmem:[#allocation5 + $0x230] sm:$0xff] }
  0x3f   :  { %979 = vmatprep.subr.mxu0 %v1334_v0  ;;  %1014 = vmatprep.subr.mxu1 %v1334_v0  ;;  %v428_v24 = vld [vmem:[#allocation5 + $0x220] sm:$0xff]  ;;  %v426_v26 = vld [vmem:[#allocation5 + $0x210] sm:$0xff] }
  0x40   :  { %980 = vmatpush3.msra.mxu0 %v56_v23  ;;  %1015 = vmatpush3.msra.mxu1 %v149_v28  ;;  %v429_v23 = vld [vmem:[#allocation5 + $0x228] sm:$0xff] }
  0x41   :  { %981 = vmatprep.subr.mxu0 %v1334_v0  ;;  %1016 = vmatprep.subr.mxu1 %v1334_v0 }
  0x42   :  { %982 = vmatpush3.msra.mxu0 %v55_v25  ;;  %1017 = vmatpush3.msra.mxu1 %v148_v31  ;;  %v427_v25 = vld [vmem:[#allocation5 + $0x218] sm:$0xff] }
  0x43   :  { %983 = vmatprep.subr.mxu0 %v1334_v0  ;;  %1018 = vmatprep.subr.mxu1 %v1334_v0 }
  0x44   :  { %984 = vmatpush3.msra.mxu0 %v54_v27  ;;  %1019 = vmatpush3.msra.mxu1 %v147_v32  ;;  %v813_v27 = vld [vmem:[#allocation7 + $0x2] ss:$0 sm:$0xff]  ;;  %v425_v32 = vld [vmem:[#allocation5 + $0x208] sm:$0xff] }
  0x45   :  { %985 = vmatprep.subr.mxu0 %v1334_v0  ;;  %1020 = vmatprep.subr.mxu1 %v1334_v0 }
  0x46   :  { %986 = vmatpush3.msra.mxu0 %v53_v29  ;;  %1021 = vmatpush3.msra.mxu1 %v146_v33  ;;  %v424_v33 = vld [vmem:[#allocation5 + $0x200] sm:$0xff] }
  0x47   :  { %988 = vmatmul.mubr.f32.vlgmr.msra.gmra.mxu0 %v52_v30  ;;  %1025 = vmatprep.subr.mxu0 %v1334_v0 }
  0x48   :  { %1057 = vmatprep.mubr.msk.f32.mxu0 %vm1335_vm0, %v1334_v0  ;;  %1060 = vmatprep.subr.mxu1 %v1334_v0 }
  0x49   :  { %1026 = vmatpush3.msra.mxu0 %v254_v34  ;;  %v532_v34 = vld [vmem:[#allocation5 + $0x2f8] sm:$0xff] }
  0x4a   :  { %1027 = vmatprep.subr.mxu0 %v1334_v0 }
  0x4b   :  { %1028 = vmatpush3.msra.mxu0 %v253_v35  ;;  %v531_v35 = vld [vmem:[#allocation5 + $0x2f0] sm:$0xff] }
  0x4c   :  { %1029 = vmatprep.subr.mxu0 %v1334_v0 }
  0x4d   :  { %1030 = vmatpush3.msra.mxu0 %v252_v36  ;;  %v530_v36 = vld [vmem:[#allocation5 + $0x2e8] sm:$0xff] }
  0x4e   :  { %1031 = vmatprep.subr.mxu0 %v1334_v0 }
  0x4f   :  { %1032 = vmatpush3.msra.mxu0 %v251_v37  ;;  %v529_v37 = vld [vmem:[#allocation5 + $0x2e0] sm:$0xff] }
  0x50   :  { %1033 = vmatprep.subr.mxu0 %v1334_v0 }
  0x51   :  { %1034 = vmatpush3.msra.mxu0 %v250_v38  ;;  %v528_v38 = vld [vmem:[#allocation5 + $0x2d8] sm:$0xff] }
  0x52   :  { %1035 = vmatprep.subr.mxu0 %v1334_v0 }
  0x53   :  { %1036 = vmatpush3.msra.mxu0 %v249_v39  ;;  %v527_v39 = vld [vmem:[#allocation5 + $0x2d0] sm:$0xff] }
  0x54   :  { %1037 = vmatprep.subr.mxu0 %v1334_v0 }
  0x55   :  { %1038 = vmatpush3.msra.mxu0 %v248_v40  ;;  %v526_v40 = vld [vmem:[#allocation5 + $0x2c8] sm:$0xff] }
  0x56   :  { %1039 = vmatprep.subr.mxu0 %v1334_v0 }
  0x57   :  { %1040 = vmatpush3.msra.mxu0 %v247_v41  ;;  %v525_v41 = vld [vmem:[#allocation5 + $0x2c0] sm:$0xff] }
  0x58   :  { %1041 = vmatprep.subr.mxu0 %v1334_v0 }
  0x59   :  { %1042 = vmatpush3.msra.mxu0 %v246_v42  ;;  %v524_v42 = vld [vmem:[#allocation5 + $0x2b8] sm:$0xff] }
  0x5a   :  { %1043 = vmatprep.subr.mxu0 %v1334_v0 }
  0x5b   :  { %1044 = vmatpush3.msra.mxu0 %v245_v43  ;;  %v523_v43 = vld [vmem:[#allocation5 + $0x2b0] sm:$0xff] }
  0x5c   :  { %1045 = vmatprep.subr.mxu0 %v1334_v0 }
  0x5d   :  { %1046 = vmatpush3.msra.mxu0 %v244_v44  ;;  %v522_v44 = vld [vmem:[#allocation5 + $0x2a8] sm:$0xff] }
  0x5e   :  { %1047 = vmatprep.subr.mxu0 %v1334_v0 }
  0x5f   :  { %1048 = vmatpush3.msra.mxu0 %v243_v45  ;;  %v521_v45 = vld [vmem:[#allocation5 + $0x2a0] sm:$0xff] }
  0x60   :  { %1049 = vmatprep.subr.mxu0 %v1334_v0 }
  0x61   :  { %1050 = vmatpush3.msra.mxu0 %v242_v46  ;;  %v520_v46 = vld [vmem:[#allocation5 + $0x298] sm:$0xff] }
  0x62   :  { %1051 = vmatprep.subr.mxu0 %v1334_v0 }
  0x63   :  { %1052 = vmatpush3.msra.mxu0 %v241_v52  ;;  %v518_v52 = vld [vmem:[#allocation5 + $0x288] sm:$0xff] }
  0x64   :  { %1053 = vmatprep.subr.mxu0 %v1334_v0 }
  0x65   :  { %1054 = vmatpush3.msra.mxu0 %v240_v53  ;;  %v517_v53 = vld [vmem:[#allocation5 + $0x280] sm:$0xff] }
  0x66   :  { %1055 = vmatprep.subr.mxu0 %v1334_v0 }
  0x67   :  { %1056 = vmatpush3.msra.mxu0 %v239_v54  ;;  %v625_v54 = vld [vmem:[#allocation5 + $0x378] sm:$0xff] }
  0x68   :  { %1095 = vmatprep.subr.mxu0 %v1334_v0 }
 0x107   :  { %v140_v48 = vpop.f32.mrf.mxu0 }
 0x108   :  { %v141_v49 = vadd.f32 %v811_v47, %v140_v48  ;;  %v814_v47 = vld [vmem:[#allocation7 + $0x3] ss:$0 sm:$0xff] }
 0x109   :  { %v989_v50 = vpop.f32.mrf.mxu0 }
 0x10a   :  { %v144_v51 = vmax.f32 %v141_v49, 0.0 }
 0x10c   :  { %1023 = vmatmul.mubr.f32.vlgmr.msra.gmra.mxu1 %v144_v51  ;;  %v519_v51 = vld [vmem:[#allocation5 + $0x290] sm:$0xff] }
 0x10d   :  { %1092 = vmatprep.mubr.msk.f32.mxu1 %vm1335_vm0, %v1334_v0  ;;  %1061 = vmatpush3.msra.mxu1 %v347_v55  ;;  %v624_v55 = vld [vmem:[#allocation5 + $0x370] sm:$0xff] }
 0x10e   :  { %1062 = vmatprep.subr.mxu1 %v1334_v0 }
 0x10f   :  { %1063 = vmatpush3.msra.mxu1 %v346_v56  ;;  %v623_v56 = vld [vmem:[#allocation5 + $0x368] sm:$0xff] }
 0x110   :  { %1064 = vmatprep.subr.mxu1 %v1334_v0 }
 0x111   :  { %1065 = vmatpush3.msra.mxu1 %v345_v57  ;;  %v622_v57 = vld [vmem:[#allocation5 + $0x360] sm:$0xff] }
 0x112   :  { %1066 = vmatprep.subr.mxu1 %v1334_v0 }
 0x113   :  { %1067 = vmatpush3.msra.mxu1 %v344_v58  ;;  %v621_v58 = vld [vmem:[#allocation5 + $0x358] sm:$0xff] }
 0x114   :  { %1068 = vmatprep.subr.mxu1 %v1334_v0 }
 0x115   :  { %1069 = vmatpush3.msra.mxu1 %v343_v59  ;;  %v620_v59 = vld [vmem:[#allocation5 + $0x350] sm:$0xff] }
 0x116   :  { %1070 = vmatprep.subr.mxu1 %v1334_v0 }
 0x117   :  { %1071 = vmatpush3.msra.mxu1 %v342_v60  ;;  %v619_v60 = vld [vmem:[#allocation5 + $0x348] sm:$0xff] }
 0x118   :  { %1072 = vmatprep.subr.mxu1 %v1334_v0 }
 0x119   :  { %1073 = vmatpush3.msra.mxu1 %v341_v61  ;;  %v618_v61 = vld [vmem:[#allocation5 + $0x340] sm:$0xff] }
 0x11a   :  { %1074 = vmatprep.subr.mxu1 %v1334_v0 }
 0x11b   :  { %1075 = vmatpush3.msra.mxu1 %v340_v62  ;;  %v617_v62 = vld [vmem:[#allocation5 + $0x338] sm:$0xff] }
 0x11c   :  { %1076 = vmatprep.subr.mxu1 %v1334_v0 }
 0x11d   :  { %1077 = vmatpush3.msra.mxu1 %v339_v63  ;;  %v616_v63 = vld [vmem:[#allocation5 + $0x330] sm:$0xff] }
 0x11e   :  { %1078 = vmatprep.subr.mxu1 %v1334_v0 }
 0x11f   :  { %1079 = vmatpush3.msra.mxu1 %v338_v1  ;;  %v615_v1 = vld [vmem:[#allocation5 + $0x328] sm:$0xff] }
 0x120   :  { %1080 = vmatprep.subr.mxu1 %v1334_v0 }
 0x121   :  { %1081 = vmatpush3.msra.mxu1 %v337_v2  ;;  %v614_v2 = vld [vmem:[#allocation5 + $0x320] sm:$0xff] }
 0x122   :  { %1082 = vmatprep.subr.mxu1 %v1334_v0 }
 0x123   :  { %1083 = vmatpush3.msra.mxu1 %v336_v3  ;;  %v613_v3 = vld [vmem:[#allocation5 + $0x318] sm:$0xff] }
 0x124   :  { %1084 = vmatprep.subr.mxu1 %v1334_v0 }
 0x125   :  { %1085 = vmatpush3.msra.mxu1 %v335_v4  ;;  %v815_v4 = vld [vmem:[#allocation7 + $0x4] ss:$0 sm:$0xff] }
 0x126   :  { %1086 = vmatprep.subr.mxu1 %v1334_v0 }
 0x127   :  { %1087 = vmatpush3.msra.mxu1 %v334_v10  ;;  %v611_v10 = vld [vmem:[#allocation5 + $0x308] sm:$0xff] }
 0x128   :  { %1088 = vmatprep.subr.mxu1 %v1334_v0 }
 0x129   :  { %1089 = vmatpush3.msra.mxu1 %v333_v11  ;;  %v610_v11 = vld [vmem:[#allocation5 + $0x300] sm:$0xff] }
 0x12a   :  { %1090 = vmatprep.subr.mxu1 %v1334_v0 }
 0x12b   :  { %1091 = vmatpush3.msra.mxu1 %v332_v12  ;;  %v718_v12 = vld [vmem:[#allocation5 + $0x3f8] sm:$0xff] }
 0x12c   :  { %1130 = vmatprep.subr.mxu1 %v1334_v0 }
 0x1cc   :  { %v233_v6 = vpop.f32.mrf.mxu1 }
 0x1cd   :  { %v234_v7 = vadd.f32 %v812_v5, %v233_v6 }
 0x1ce   :  { %v1024_v8 = vpop.f32.mrf.mxu1 }
 0x1cf   :  { %v237_v9 = vmax.f32 %v234_v7, 0.0 }
 0x1d1   :  { %1058 = vmatmul.mubr.f32.vlgmr.msra.gmra.mxu0 %v237_v9  ;;  %v612_v9 = vld [vmem:[#allocation5 + $0x310] sm:$0xff] }
 0x1d2   :  { %1127 = vmatprep.mubr.msk.f32.mxu0 %vm1335_vm0, %v1334_v0  ;;  %1096 = vmatpush3.msra.mxu0 %v439_v13  ;;  %v717_v13 = vld [vmem:[#allocation5 + $0x3f0] sm:$0xff] }
 0x1d3   :  { %1097 = vmatprep.subr.mxu0 %v1334_v0 }
 0x1d4   :  { %1098 = vmatpush3.msra.mxu0 %v438_v14  ;;  %v716_v14 = vld [vmem:[#allocation5 + $0x3e8] sm:$0xff] }
 0x1d5   :  { %1099 = vmatprep.subr.mxu0 %v1334_v0 }
 0x1d6   :  { %1100 = vmatpush3.msra.mxu0 %v437_v15  ;;  %v715_v15 = vld [vmem:[#allocation5 + $0x3e0] sm:$0xff] }
 0x1d7   :  { %1101 = vmatprep.subr.mxu0 %v1334_v0 }
 0x1d8   :  { %1102 = vmatpush3.msra.mxu0 %v436_v16  ;;  %v714_v16 = vld [vmem:[#allocation5 + $0x3d8] sm:$0xff] }
 0x1d9   :  { %1103 = vmatprep.subr.mxu0 %v1334_v0 }
 0x1da   :  { %1104 = vmatpush3.msra.mxu0 %v435_v17  ;;  %v713_v17 = vld [vmem:[#allocation5 + $0x3d0] sm:$0xff] }
 0x1db   :  { %1105 = vmatprep.subr.mxu0 %v1334_v0 }
 0x1dc   :  { %1106 = vmatpush3.msra.mxu0 %v434_v18  ;;  %v712_v18 = vld [vmem:[#allocation5 + $0x3c8] sm:$0xff] }
 0x1dd   :  { %1107 = vmatprep.subr.mxu0 %v1334_v0 }
 0x1de   :  { %1108 = vmatpush3.msra.mxu0 %v433_v19  ;;  %v711_v19 = vld [vmem:[#allocation5 + $0x3c0] sm:$0xff] }
 0x1df   :  { %1109 = vmatprep.subr.mxu0 %v1334_v0 }
 0x1e0   :  { %1110 = vmatpush3.msra.mxu0 %v432_v20  ;;  %v710_v20 = vld [vmem:[#allocation5 + $0x3b8] sm:$0xff] }
 0x1e1   :  { %1111 = vmatprep.subr.mxu0 %v1334_v0 }
 0x1e2   :  { %1112 = vmatpush3.msra.mxu0 %v431_v21  ;;  %v709_v21 = vld [vmem:[#allocation5 + $0x3b0] sm:$0xff] }
 0x1e3   :  { %1113 = vmatprep.subr.mxu0 %v1334_v0 }
 0x1e4   :  { %1114 = vmatpush3.msra.mxu0 %v430_v22  ;;  %v708_v22 = vld [vmem:[#allocation5 + $0x3a8] sm:$0xff] }
 0x1e5   :  { %1115 = vmatprep.subr.mxu0 %v1334_v0 }
 0x1e6   :  { %1116 = vmatpush3.msra.mxu0 %v429_v23  ;;  %v707_v23 = vld [vmem:[#allocation5 + $0x3a0] sm:$0xff] }
 0x1e7   :  { %1117 = vmatprep.subr.mxu0 %v1334_v0 }
 0x1e8   :  { %1118 = vmatpush3.msra.mxu0 %v428_v24  ;;  %v706_v24 = vld [vmem:[#allocation5 + $0x398] sm:$0xff] }
 0x1e9   :  { %1119 = vmatprep.subr.mxu0 %v1334_v0 }
 0x1ea   :  { %1120 = vmatpush3.msra.mxu0 %v427_v25  ;;  %v816_v25 = vld [vmem:[#allocation7 + $0x5] ss:$0 sm:$0xff] }
 0x1eb   :  { %1121 = vmatprep.subr.mxu0 %v1334_v0 }
 0x1ec   :  { %1122 = vmatpush3.msra.mxu0 %v426_v26 }
 0x1ed   :  { %1123 = vmatprep.subr.mxu0 %v1334_v0 }
 0x1ee   :  { %1124 = vmatpush3.msra.mxu0 %v425_v32  ;;  %v703_v32 = vld [vmem:[#allocation5 + $0x380] sm:$0xff] }
 0x1ef   :  { %1125 = vmatprep.subr.mxu0 %v1334_v0 }
 0x1f0   :  { %1126 = vmatpush3.msra.mxu0 %v424_v33  ;;  %v817_v33 = vld [vmem:[#allocation7 + $0x6] ss:$0 sm:$0xff] }
 0x1f1   :  { %1165 = vmatprep.subr.mxu0 %v1334_v0 }
 0x291   :  { %v326_v28 = vpop.f32.mrf.mxu0 }
 0x292   :  { %v327_v29 = vadd.f32 %v813_v27, %v326_v28 }
 0x293   :  { %v1059_v30 = vpop.f32.mrf.mxu0 }
 0x294   :  { %v330_v31 = vmax.f32 %v327_v29, 0.0  ;;  %v705_v30 = vld [vmem:[#allocation5 + $0x390] sm:$0xff] }
 0x296   :  { %1093 = vmatmul.mubr.f32.vlgmr.msra.gmra.mxu1 %v330_v31  ;;  %v704_v31 = vld [vmem:[#allocation5 + $0x388] sm:$0xff] }
 0x297   :  { %1162 = vmatprep.mubr.msk.f32.mxu1 %vm1335_vm0, %v1334_v0  ;;  %1131 = vmatpush3.msra.mxu1 %v532_v34 }
 0x298   :  { %1132 = vmatprep.subr.mxu1 %v1334_v0 }
 0x299   :  { %1133 = vmatpush3.msra.mxu1 %v531_v35 }
 0x29a   :  { %1134 = vmatprep.subr.mxu1 %v1334_v0 }
 0x29b   :  { %1135 = vmatpush3.msra.mxu1 %v530_v36 }
 0x29c   :  { %1136 = vmatprep.subr.mxu1 %v1334_v0 }
 0x29d   :  { %1137 = vmatpush3.msra.mxu1 %v529_v37 }
 0x29e   :  { %1138 = vmatprep.subr.mxu1 %v1334_v0 }
 0x29f   :  { %1139 = vmatpush3.msra.mxu1 %v528_v38  ;;  %v818_v38 = vld [vmem:[#allocation7 + $0x7] ss:$0 sm:$0xff] }
 0x2a0   :  { %1140 = vmatprep.subr.mxu1 %v1334_v0 }
 0x2a1   :  { %1141 = vmatpush3.msra.mxu1 %v527_v39 }
 0x2a2   :  { %1142 = vmatprep.subr.mxu1 %v1334_v0 }
 0x2a3   :  { %1143 = vmatpush3.msra.mxu1 %v526_v40 }
 0x2a4   :  { %1144 = vmatprep.subr.mxu1 %v1334_v0 }
 0x2a5   :  { %1145 = vmatpush3.msra.mxu1 %v525_v41 }
 0x2a6   :  { %1146 = vmatprep.subr.mxu1 %v1334_v0 }
 0x2a7   :  { %1147 = vmatpush3.msra.mxu1 %v524_v42 }
 0x2a8   :  { %1148 = vmatprep.subr.mxu1 %v1334_v0 }
 0x2a9   :  { %1149 = vmatpush3.msra.mxu1 %v523_v43 }
 0x2aa   :  { %1150 = vmatprep.subr.mxu1 %v1334_v0 }
 0x2ab   :  { %1151 = vmatpush3.msra.mxu1 %v522_v44 }
 0x2ac   :  { %1152 = vmatprep.subr.mxu1 %v1334_v0 }
 0x2ad   :  { %1153 = vmatpush3.msra.mxu1 %v521_v45 }
 0x2ae   :  { %1154 = vmatprep.subr.mxu1 %v1334_v0 }
 0x2af   :  { %1155 = vmatpush3.msra.mxu1 %v520_v46 }
 0x2b0   :  { %1156 = vmatprep.subr.mxu1 %v1334_v0 }
 0x2b1   :  { %1157 = vmatpush3.msra.mxu1 %v519_v51 }
 0x2b2   :  { %1158 = vmatprep.subr.mxu1 %v1334_v0 }
 0x2b3   :  { %1159 = vmatpush3.msra.mxu1 %v518_v52 }
 0x2b4   :  { %1160 = vmatprep.subr.mxu1 %v1334_v0 }
 0x2b5   :  { %1161 = vmatpush3.msra.mxu1 %v517_v53 }
 0x2b6   :  { %1200 = vmatprep.subr.mxu1 %v1334_v0 }
 0x356   :  { %v419_v48 = vpop.f32.mrf.mxu1 }
 0x357   :  { %v420_v49 = vadd.f32 %v814_v47, %v419_v48 }
 0x358   :  { %v1094_v50 = vpop.f32.mrf.mxu1 }
 0x359   :  { %1128 = vmatmul.mubr.f32.vlgmr.msra.gmra.mxu0 %v420_v49 }
 0x35a   :  { %1197 = vmatprep.mubr.msk.f32.mxu0 %vm1335_vm0, %v1334_v0  ;;  %1166 = vmatpush3.msra.mxu0 %v625_v54 }
 0x35b   :  { %1167 = vmatprep.subr.mxu0 %v1334_v0 }
 0x35c   :  { %1168 = vmatpush3.msra.mxu0 %v624_v55 }
 0x35d   :  { %1169 = vmatprep.subr.mxu0 %v1334_v0 }
 0x35e   :  { %1170 = vmatpush3.msra.mxu0 %v623_v56 }
 0x35f   :  { %1171 = vmatprep.subr.mxu0 %v1334_v0 }
 0x360   :  { %1172 = vmatpush3.msra.mxu0 %v622_v57 }
 0x361   :  { %1173 = vmatprep.subr.mxu0 %v1334_v0 }
 0x362   :  { %1174 = vmatpush3.msra.mxu0 %v621_v58 }
 0x363   :  { %1175 = vmatprep.subr.mxu0 %v1334_v0 }
 0x364   :  { %1176 = vmatpush3.msra.mxu0 %v620_v59 }
 0x365   :  { %1177 = vmatprep.subr.mxu0 %v1334_v0 }
 0x366   :  { %1178 = vmatpush3.msra.mxu0 %v619_v60 }
 0x367   :  { %1179 = vmatprep.subr.mxu0 %v1334_v0 }
 0x368   :  { %1180 = vmatpush3.msra.mxu0 %v618_v61 }
 0x369   :  { %1181 = vmatprep.subr.mxu0 %v1334_v0 }
 0x36a   :  { %1182 = vmatpush3.msra.mxu0 %v617_v62 }
 0x36b   :  { %1183 = vmatprep.subr.mxu0 %v1334_v0 }
 0x36c   :  { %1184 = vmatpush3.msra.mxu0 %v616_v63 }
 0x36d   :  { %1185 = vmatprep.subr.mxu0 %v1334_v0 }
 0x36e   :  { %1186 = vmatpush3.msra.mxu0 %v615_v1 }
 0x36f   :  { %1187 = vmatprep.subr.mxu0 %v1334_v0 }
 0x370   :  { %1188 = vmatpush3.msra.mxu0 %v614_v2 }
 0x371   :  { %1189 = vmatprep.subr.mxu0 %v1334_v0 }
 0x372   :  { %1190 = vmatpush3.msra.mxu0 %v613_v3 }
 0x373   :  { %1191 = vmatprep.subr.mxu0 %v1334_v0 }
 0x374   :  { %1192 = vmatpush3.msra.mxu0 %v612_v9 }
 0x375   :  { %1193 = vmatprep.subr.mxu0 %v1334_v0 }
 0x376   :  { %1194 = vmatpush3.msra.mxu0 %v611_v10 }
 0x377   :  { %1195 = vmatprep.subr.mxu0 %v1334_v0 }
 0x378   :  { %1196 = vmatpush3.msra.mxu0 %v610_v11 }
 0x419   :  { %v511_v5 = vpop.f32.mrf.mxu0 }
 0x41a   :  { %v512_v6 = vadd.f32 %v815_v4, %v511_v5 }
 0x41b   :  { %v1129_v7 = vpop.f32.mrf.mxu0 }
 0x41c   :  { %v515_v8 = vmax.f32 %v512_v6, 0.0 }
 0x41e   :  { %1163 = vmatmul.mubr.f32.vlgmr.msra.gmra.mxu1 %v515_v8 }
 0x41f   :  { %1232 = vmatprep.mubr.msk.f32.mxu1 %vm1335_vm0, %v1334_v0  ;;  %1201 = vmatpush3.msra.mxu1 %v718_v12 }
 0x420   :  { %1202 = vmatprep.subr.mxu1 %v1334_v0 }
 0x421   :  { %1203 = vmatpush3.msra.mxu1 %v717_v13 }
 0x422   :  { %1204 = vmatprep.subr.mxu1 %v1334_v0 }
 0x423   :  { %1205 = vmatpush3.msra.mxu1 %v716_v14 }
 0x424   :  { %1206 = vmatprep.subr.mxu1 %v1334_v0 }
 0x425   :  { %1207 = vmatpush3.msra.mxu1 %v715_v15 }
 0x426   :  { %1208 = vmatprep.subr.mxu1 %v1334_v0 }
 0x427   :  { %1209 = vmatpush3.msra.mxu1 %v714_v16 }
 0x428   :  { %1210 = vmatprep.subr.mxu1 %v1334_v0 }
 0x429   :  { %1211 = vmatpush3.msra.mxu1 %v713_v17 }
 0x42a   :  { %1212 = vmatprep.subr.mxu1 %v1334_v0 }
 0x42b   :  { %1213 = vmatpush3.msra.mxu1 %v712_v18 }
 0x42c   :  { %1214 = vmatprep.subr.mxu1 %v1334_v0 }
 0x42d   :  { %1215 = vmatpush3.msra.mxu1 %v711_v19 }
 0x42e   :  { %1216 = vmatprep.subr.mxu1 %v1334_v0 }
 0x42f   :  { %1217 = vmatpush3.msra.mxu1 %v710_v20 }
 0x430   :  { %1218 = vmatprep.subr.mxu1 %v1334_v0 }
 0x431   :  { %1219 = vmatpush3.msra.mxu1 %v709_v21 }
 0x432   :  { %1220 = vmatprep.subr.mxu1 %v1334_v0 }
 0x433   :  { %1221 = vmatpush3.msra.mxu1 %v708_v22 }
 0x434   :  { %1222 = vmatprep.subr.mxu1 %v1334_v0 }
 0x435   :  { %1223 = vmatpush3.msra.mxu1 %v707_v23 }
 0x436   :  { %1224 = vmatprep.subr.mxu1 %v1334_v0 }
 0x437   :  { %1225 = vmatpush3.msra.mxu1 %v706_v24 }
 0x438   :  { %1226 = vmatprep.subr.mxu1 %v1334_v0 }
 0x439   :  { %1227 = vmatpush3.msra.mxu1 %v705_v30 }
 0x43a   :  { %1228 = vmatprep.subr.mxu1 %v1334_v0 }
 0x43b   :  { %1229 = vmatpush3.msra.mxu1 %v704_v31 }
 0x43c   :  { %1230 = vmatprep.subr.mxu1 %v1334_v0 }
 0x43d   :  { %1231 = vmatpush3.msra.mxu1 %v703_v32 }
 0x4de   :  { %v604_v26 = vpop.f32.mrf.mxu1 }
 0x4df   :  { %v605_v27 = vadd.f32 %v816_v25, %v604_v26 }
 0x4e0   :  { %v1164_v28 = vpop.f32.mrf.mxu1 }
 0x4e1   :  { %v608_v29 = vmax.f32 %v605_v27, 0.0 }
 0x4e3   :  { %1198 = vmatmul.mubr.f32.vlgmr.msra.gmra.mxu0 %v608_v29 }
 0x5a3   :  { %v697_v34 = vpop.f32.mrf.mxu0 }
 0x5a4   :  { %v698_v35 = vadd.f32 %v817_v33, %v697_v34 }
 0x5a5   :  { %v1199_v36 = vpop.f32.mrf.mxu0 }
 0x5a6   :  { %v701_v37 = vmax.f32 %v698_v35, 0.0 }
 0x5a8   :  { %1233 = vmatmul.mubr.f32.vlgmr.msra.gmra.mxu1 %v701_v37 }
 0x668   :  { %v790_v39 = vpop.f32.mrf.mxu1 }
 0x669   :  { %v791_v40 = vadd.f32 %v818_v38, %v790_v39 }
 0x66a   :  { %v1234_v41 = vpop.f32.mrf.mxu1 }
 0x66b   :  { %794 = vst [vmem:[#allocation8] sm:$0xff] %v791_v40 }
 0x66c   :  { %1314 = shalt.err (!%p1311_p5)
}
 0x66d   :  { %804 = dma.vmem_to_hbm [thread:$0]  %s802_s2, 128, %s1516_s3, [#allocation4]  }
 0x66e   :  { %1327 = dma.done.wait [#allocation4], 128  }
 0x66f   :  { %1328 = vsyncadd [#allocation4], 4294967168 }
 0x670   :  { %808 = vsyncpa [#allocation3], 1 }
 0x671   :  { %809 = vsyncpa [#allocation6], 1 }
 0x672   :  { %810 = vsyncpa [#allocation4], 1 }

</bundles_post_ra>
